<compile_context>
chip_gen: v5e
topology: v5e:2x2
jax: 0.10.0
libtpu: 0.0.40
codegen_flags: <defaults>
</compile_context>

<pallas_src>
import functools

import jax
import jax.numpy as jnp
from jax import lax
from jax.experimental import pallas as pl
from jax.experimental.pallas import tpu as pltpu

KH = KW = 3  # kernal_size=3 (module default)


def _fused_sepconv_kernel(dw_ref, pw_ref, x_ref, o_ref, *, W, HW):
    """Fused depthwise-3x3 + pointwise-1x1 on one sublane-packed (rows, H*W) slab.

    dw_ref: (R, KH*KW)  per-row depthwise taps (channel taps tiled over batch)
    pw_ref: (R, R)      block-diagonal pointwise weight (pw repeated per batch)
    x_ref : (R, H*W)    rows = (batch, channel) pairs, lanes = flat spatial
    o_ref : (R, H*W)    full slab; lanes with h >= Ho or w >= Wo hold wrap
                        garbage and are cropped by the wrapper.
    """
    x = x_ref[...].astype(jnp.float32)          # (R, HW): lane-dense, sublane-full
    taps = dw_ref[...].astype(jnp.float32)      # single hoisted load of all taps

    # ---- depthwise 3x3 (groups=C): 9 lane-rolls (XLU) + 9 broadcast FMAs (VPU) ----
    # Rolls never mix rows (axis=1 only), so packing batch on sublanes is safe,
    # and wrapped positions only land in h >= Ho / w >= Wo lanes (requires the
    # full H*W extent per row; see halo TODO above).
    acc = jnp.zeros_like(x)
    for kh in range(KH):
        for kw in range(KW):
            s = kh * W + kw
            k = kh * KW + kw
            shifted = x if s == 0 else pltpu.roll(x, shift=HW - s, axis=1)
            acc = acc + shifted * taps[:, k:k + 1]      # (R,1) lane-broadcast FMA

    # ---- pointwise 1x1 conv: block-diagonal channel mix, one small MXU matmul ----
    # Only same-batch rows are mixed, by construction of pw_ref (f32 accumulate).
    mixed = jnp.dot(pw_ref[...].astype(jnp.float32), acc,
                    preferred_element_type=jnp.float32)

    # Full-slab store: last dim H*W is a multiple of 128 -> unmasked vst.
    o_ref[...] = mixed.astype(o_ref.dtype)


def separable_conv2d(x, dw_w, pw_w, *, batch_blocks=1):
    """x: (N, C, H, W); dw_w: (C, KH, KW); pw_w: (C, C). Returns (N, C, H-2, W-2)."""
    N, C, H, W = x.shape
    assert H >= KH and W >= KW, "flat-roll depthwise requires H >= KH and W >= KW"
    assert N % batch_blocks == 0
    Nb = N // batch_blocks                 # batch elements per grid step
    R = Nb * C                             # sublane rows per block
    # batch_blocks == 1 spans the full row axis (tiling rule trivially satisfied);
    # any split must keep per-block rows a multiple of 8 sublanes.
    assert batch_blocks == 1 or R % 8 == 0, "per-block rows must be a multiple of 8"
    Ho, Wo = H - KH + 1, W - KW + 1
    HW = H * W

    # Layout plumbing (contiguous reshapes / tiny weight prep, outside the kernel).
    x_rows = x.reshape(N * C, HW)                              # (N*C, H*W)
    taps = jnp.tile(dw_w.reshape(C, KH * KW), (Nb, 1))         # (R, 9)
    pw_bd = jnp.kron(jnp.eye(Nb, dtype=pw_w.dtype), pw_w)      # (R, R) block-diag

    kernel = functools.partial(_fused_sepconv_kernel, W=W, HW=HW)

    itemsize = jnp.dtype(x.dtype).itemsize
    cost = pl.CostEstimate(
        flops=2 * N * C * HW * (KH * KW + C),
        transcendentals=0,
        bytes_accessed=(2 * N * C * HW) * itemsize
        + taps.size * taps.dtype.itemsize + pw_bd.size * pw_bd.dtype.itemsize,
    )

    out_rows = pl.pallas_call(
        kernel,
        out_shape=jax.ShapeDtypeStruct((N * C, HW), x.dtype),
        grid=(batch_blocks,),
        in_specs=[
            pl.BlockSpec((R, KH * KW), lambda i: (0, 0)),   # taps, resident
            pl.BlockSpec((R, R), lambda i: (0, 0)),         # block-diag pw, resident
            pl.BlockSpec((R, HW), lambda i: (i, 0)),        # batch-chunk of rows
        ],
        out_specs=pl.BlockSpec((R, HW), lambda i: (i, 0)),
        compiler_params=pltpu.CompilerParams(
            dimension_semantics=("parallel",)),              # megacore if split
        cost_estimate=cost,
    )(taps, pw_bd, x_rows)

    # VALID crop done in the wrapper so the kernel's stores stay lane-dense.
    return out_rows.reshape(N, C, H, W)[:, :, :Ho, :Wo]


def ref_separable_conv2d(x, dw_w, pw_w):
    """Pure-JAX reference matching torch's Conv2d semantics."""
    N, C, H, W = x.shape
    dw_k = dw_w.reshape(C, 1, KH, KW)
    y = lax.conv_general_dilated(
        x, dw_k, window_strides=(1, 1), padding="VALID",
        dimension_numbers=("NCHW", "OIHW", "NCHW"), feature_group_count=C)
    pw_k = pw_w.reshape(C, C, 1, 1)
    return lax.conv_general_dilated(
        y, pw_k, window_strides=(1, 1), padding="VALID",
        dimension_numbers=("NCHW", "OIHW", "NCHW"))


if __name__ == "__main__":
    N, C, H, W = 2, 4, 16, 16
    key = jax.random.PRNGKey(0)
    kx, kd, kp = jax.random.split(key, 3)
    x = jax.random.normal(kx, (N, C, H, W), jnp.float32)
    # deterministic synthetic parameters (shapes per nn.Conv2d in __init__)
    dw_w = jax.random.normal(kd, (C, KH, KW), jnp.float32) * 0.1   # (C, 1, 3, 3) squeezed
    pw_w = jax.random.normal(kp, (C, C), jnp.float32) * 0.1        # (C, C, 1, 1) squeezed

    out = jax.block_until_ready(separable_conv2d(x, dw_w, pw_w))
    ref = ref_separable_conv2d(x, dw_w, pw_w)

    assert out.shape == (N, C, H - 2, W - 2), out.shape
    assert jnp.allclose(out, ref, atol=1e-4, rtol=1e-4), float(jnp.max(jnp.abs(out - ref)))
    print("KERNEL_OK")
</pallas_src>

<mosaic_0001>
module attributes {stable_mosaic.version = 11 : i64} {
  func.func @_fused_sepconv_kernel(%arg0: i32, %arg1: memref<8x9xf32, #tpu.memory_space<vmem>>, %arg2: memref<8x8xf32, #tpu.memory_space<vmem>>, %arg3: memref<8x256xf32, #tpu.memory_space<vmem>>, %arg4: memref<8x256xf32, #tpu.memory_space<vmem>>) attributes {dimension_semantics = [#tpu.dimension_semantics<parallel>], iteration_bounds = array<i64: 1>, scalar_prefetch = 0 : i64, scratch_operands = 0 : i64, tpu.core_type = #tpu.core_type<tc>, window_params = [{pipeline_mode = #tpu.pipeline_mode<synchronous>, transform_indices = @transform_0, window_bounds = array<i64: 8, 9>}, {pipeline_mode = #tpu.pipeline_mode<synchronous>, transform_indices = @transform_1, window_bounds = array<i64: 8, 8>}, {transform_indices = @transform_2, window_bounds = array<i64: 8, 256>}, {transform_indices = @transform_3, window_bounds = array<i64: 8, 256>}]} {
    %c0 = arith.constant 0 : index
    %c0_0 = arith.constant 0 : index
    %0 = vector.load %arg3[%c0, %c0_0] : memref<8x256xf32, #tpu.memory_space<vmem>>, vector<8x256xf32>
    %c0_1 = arith.constant 0 : index
    %c0_2 = arith.constant 0 : index
    %1 = vector.load %arg1[%c0_1, %c0_2] : memref<8x9xf32, #tpu.memory_space<vmem>>, vector<8x9xf32>
    %cst = arith.constant 0.000000e+00 : f32
    %2 = vector.broadcast %cst : f32 to vector<8x256xf32>
    %3 = vector.extract_strided_slice %1 {offsets = [0, 0], sizes = [8, 1], strides = [1, 1]} : vector<8x9xf32> to vector<8x1xf32>
    %4 = vector.broadcast %3 : vector<8x1xf32> to vector<8x256xf32>
    %5 = arith.mulf %0, %4 : vector<8x256xf32>
    %6 = arith.addf %2, %5 : vector<8x256xf32>
    %c255_i32 = arith.constant 255 : i32
    %7 = tpu.dynamic_rotate %0 by %c255_i32 dim 1 : vector<8x256xf32>, i32 -> vector<8x256xf32>
    %8 = vector.extract_strided_slice %1 {offsets = [0, 1], sizes = [8, 1], strides = [1, 1]} : vector<8x9xf32> to vector<8x1xf32>
    %9 = vector.broadcast %8 : vector<8x1xf32> to vector<8x256xf32>
    %10 = arith.mulf %7, %9 : vector<8x256xf32>
    %11 = arith.addf %6, %10 : vector<8x256xf32>
    %c254_i32 = arith.constant 254 : i32
    %12 = tpu.dynamic_rotate %0 by %c254_i32 dim 1 : vector<8x256xf32>, i32 -> vector<8x256xf32>
    %13 = vector.extract_strided_slice %1 {offsets = [0, 2], sizes = [8, 1], strides = [1, 1]} : vector<8x9xf32> to vector<8x1xf32>
    %14 = vector.broadcast %13 : vector<8x1xf32> to vector<8x256xf32>
    %15 = arith.mulf %12, %14 : vector<8x256xf32>
    %16 = arith.addf %11, %15 : vector<8x256xf32>
    %c240_i32 = arith.constant 240 : i32
    %17 = tpu.dynamic_rotate %0 by %c240_i32 dim 1 : vector<8x256xf32>, i32 -> vector<8x256xf32>
    %18 = vector.extract_strided_slice %1 {offsets = [0, 3], sizes = [8, 1], strides = [1, 1]} : vector<8x9xf32> to vector<8x1xf32>
    %19 = vector.broadcast %18 : vector<8x1xf32> to vector<8x256xf32>
    %20 = arith.mulf %17, %19 : vector<8x256xf32>
    %21 = arith.addf %16, %20 : vector<8x256xf32>
    %c239_i32 = arith.constant 239 : i32
    %22 = tpu.dynamic_rotate %0 by %c239_i32 dim 1 : vector<8x256xf32>, i32 -> vector<8x256xf32>
    %23 = vector.extract_strided_slice %1 {offsets = [0, 4], sizes = [8, 1], strides = [1, 1]} : vector<8x9xf32> to vector<8x1xf32>
    %24 = vector.broadcast %23 : vector<8x1xf32> to vector<8x256xf32>
    %25 = arith.mulf %22, %24 : vector<8x256xf32>
    %26 = arith.addf %21, %25 : vector<8x256xf32>
    %c238_i32 = arith.constant 238 : i32
    %27 = tpu.dynamic_rotate %0 by %c238_i32 dim 1 : vector<8x256xf32>, i32 -> vector<8x256xf32>
    %28 = vector.extract_strided_slice %1 {offsets = [0, 5], sizes = [8, 1], strides = [1, 1]} : vector<8x9xf32> to vector<8x1xf32>
    %29 = vector.broadcast %28 : vector<8x1xf32> to vector<8x256xf32>
    %30 = arith.mulf %27, %29 : vector<8x256xf32>
    %31 = arith.addf %26, %30 : vector<8x256xf32>
    %c224_i32 = arith.constant 224 : i32
    %32 = tpu.dynamic_rotate %0 by %c224_i32 dim 1 : vector<8x256xf32>, i32 -> vector<8x256xf32>
    %33 = vector.extract_strided_slice %1 {offsets = [0, 6], sizes = [8, 1], strides = [1, 1]} : vector<8x9xf32> to vector<8x1xf32>
    %34 = vector.broadcast %33 : vector<8x1xf32> to vector<8x256xf32>
    %35 = arith.mulf %32, %34 : vector<8x256xf32>
    %36 = arith.addf %31, %35 : vector<8x256xf32>
    %c223_i32 = arith.constant 223 : i32
    %37 = tpu.dynamic_rotate %0 by %c223_i32 dim 1 : vector<8x256xf32>, i32 -> vector<8x256xf32>
    %38 = vector.extract_strided_slice %1 {offsets = [0, 7], sizes = [8, 1], strides = [1, 1]} : vector<8x9xf32> to vector<8x1xf32>
    %39 = vector.broadcast %38 : vector<8x1xf32> to vector<8x256xf32>
    %40 = arith.mulf %37, %39 : vector<8x256xf32>
    %41 = arith.addf %36, %40 : vector<8x256xf32>
    %c222_i32 = arith.constant 222 : i32
    %42 = tpu.dynamic_rotate %0 by %c222_i32 dim 1 : vector<8x256xf32>, i32 -> vector<8x256xf32>
    %43 = vector.extract_strided_slice %1 {offsets = [0, 8], sizes = [8, 1], strides = [1, 1]} : vector<8x9xf32> to vector<8x1xf32>
    %44 = vector.broadcast %43 : vector<8x1xf32> to vector<8x256xf32>
    %45 = arith.mulf %42, %44 : vector<8x256xf32>
    %46 = arith.addf %41, %45 : vector<8x256xf32>
    %c0_3 = arith.constant 0 : index
    %c0_4 = arith.constant 0 : index
    %47 = vector.load %arg2[%c0_3, %c0_4] : memref<8x8xf32, #tpu.memory_space<vmem>>, vector<8x8xf32>
    %cst_5 = arith.constant dense<0.000000e+00> : vector<8x256xf32>
    %48 = tpu.matmul %47, %46, %cst_5 {dimension_numbers = #tpu.dot_dimension_numbers<[1], [0], [0], [1], [0, 0, 1, 1], [], []>} : vector<8x8xf32>, vector<8x256xf32>, vector<8x256xf32> -> vector<8x256xf32>
    %c0_6 = arith.constant 0 : index
    %c0_7 = arith.constant 0 : index
    %49 = vector.load %arg4[%c0_6, %c0_7] : memref<8x256xf32, #tpu.memory_space<vmem>>, vector<8x256xf32>
    tpu.vector_store %arg4[%c0_6, %c0_7], %48 {strides = array<i32>} : memref<8x256xf32, #tpu.memory_space<vmem>>, vector<8x256xf32>,
    return
  }
  func.func @transform_0(%arg0: i32) -> (i32, i32) {
    %c0_i32 = arith.constant 0 : i32
    %c0_i32_0 = arith.constant 0 : i32
    %c0_i32_1 = arith.constant 0 : i32
    return %c0_i32, %c0_i32_0 : i32, i32
  }
  func.func @transform_1(%arg0: i32) -> (i32, i32) {
    %c0_i32 = arith.constant 0 : i32
    %c0_i32_0 = arith.constant 0 : i32
    %c0_i32_1 = arith.constant 0 : i32
    return %c0_i32, %c0_i32_0 : i32, i32
  }
  func.func @transform_2(%arg0: i32) -> (i32, i32) {
    %c0_i32 = arith.constant 0 : i32
    %c0_i32_0 = arith.constant 0 : i32
    return %arg0, %c0_i32 : i32, i32
  }
  func.func @transform_3(%arg0: i32) -> (i32, i32) {
    %c0_i32 = arith.constant 0 : i32
    %c0_i32_0 = arith.constant 0 : i32
    return %arg0, %c0_i32 : i32, i32
  }
}

</mosaic_0001>

<bundles_post_ra>
// kernel: tpu_custom_call.1
= control target key start
LH: loop header
LB: loop body
LE: loop exit
PB: predicated region body
PF: predicated region fallthrough
CT: control target
= control target key end

     0   :  { %8 = vsyncpa [#allocation3], 0  ;;  %s465_s0 = inlined_call_operand.hbm [shape: f32[8,9], index: 0, kind: input, shape index: {}]   ;;  %s466_s1 = inlined_call_operand.hbm [shape: f32[8,8], index: 1, kind: input, shape index: {}]   ;;  %s467_s2 = inlined_call_operand.hbm [shape: f32[8,256], index: 2, kind: input, shape index: {}]   ;;  %s468_s3 = inlined_call_operand.hbm [shape: f32[8,256], index: 3, kind: output, shape index: {}]  }
   0x1   :  { %9 = vsyncpa [#allocation6], 0  ;;  %s27_s14 = sshll.u32 %s466_s1, 4  ;;  %s28_s14 = int_to_ptr.hbm [resolvable:$true] %s27_s14 }
   0x2   :  { %10 = vsyncpa [#allocation4], 0  ;;  %s390_s15 = smov [#allocation5]   ;;  %s16_s19 = sshll.u32 %s465_s0, 4  ;;  %s17_s19 = int_to_ptr.hbm [resolvable:$true] %s16_s19 }
   0x3   :  { %s29_s16 = sshll.u32 %s390_s15, 4  ;;  %s391_s20 = smov [#allocation2]   ;;  %s30_s16 = int_to_ptr.vmem [resolvable:$true] %s29_s16 }
   0x4   :  { %32 = dma.hbm_to_vmem [thread:$0]  %s28_s14, 128, %s30_s16, [#allocation6]  }
   0x5   :  { %s18_s21 = sshll.u32 %s391_s20, 4  ;;  %s38_s24 = sshll.u32 %s467_s2, 4  ;;  %s19_s21 = int_to_ptr.vmem [resolvable:$true] %s18_s21  ;;  %s39_s24 = int_to_ptr.hbm [resolvable:$true] %s38_s24 }
   0x6   :  { %21 = dma.hbm_to_vmem [thread:$0]  %s17_s19, 128, %s19_s21, [#allocation3]  }
   0x7   :  { %s392_s1 = smov [#allocation7]  }
   0x8   :  { %s40_s25 = sshll.u32 %s392_s1, 4  ;;  %s41_s25 = int_to_ptr.vmem [resolvable:$true] %s40_s25 }
   0x9   :  { %43 = dma.hbm_to_vmem [thread:$0]  %s39_s24, 256, %s41_s25, [#allocation6]  }
   0xa   :  { %384 = dma.done.wait [#allocation3], 128  }
   0xb   :  { %385 = vsyncadd [#allocation3], 4294967168 }
   0xc   :  { %386 = dma.done.wait [#allocation6], 384  }
   0xd   :  { %387 = vsyncadd [#allocation6], 4294966912  ;;  %v393_v0 = vmov 0   ;;  %v394_v1 = vmov 2   ;;  %v58_v2 = vld [vmem:[#allocation2] sm:$0xff]  ;;  %v440_v3 = vld [vmem:[#allocation7] sm:$0xff]  ;;  %v72_v27 = vlaneseq }
   0xe   :  { %278 = vset.pattern.permute.xlu1 %v393_v0  ;;  %280 = vset.pattern.permute.xlu0 %v394_v1  ;;  %s395_s0 = smov 127   ;;  %s396_s2 = smov 126   ;;  %v444_v4 = vld [vmem:[#allocation7 + $0x8] sm:$0xff]  ;;  %v397_v5 = vmov 1   ;;  %v399_v6 = vmov 3   ;;  %v401_v7 = vmov 8  }
   0xf   :  { %61 = vperm.xlu1 %278, %v58_v2   ;;  %68 = vrot.lane.b32.xlu0 %v440_v3, %s395_s0  ;;  %s398_s26 = smov 112   ;;  %s400_s27 = smov 111   ;;  %v403_v8 = vmov 4   ;;  %v405_v9 = vmov 5   ;;  %v407_v10 = vmov 6   ;;  %v409_v11 = vmov 7  }
  0x10   :  { %85 = vrot.lane.b32.xlu2 %v440_v3, %s396_s2  ;;  %s402_s28 = smov 110   ;;  %s404_s29 = smov 96   ;;  %v73_v28 = vand.u32 127, %v72_v27  ;;  %vm191_vm8 = vcmask 64512  }
  0x11   :  { %s406_s30 = smov 95   ;;  %s408_s4 = smov 94  }
  0x12   :  { %vm74_vm0 = vcmp.lt.s32.totalorder %v73_v28, 127  ;;  %vm89_vm1 = vcmp.lt.s32.totalorder %v73_v28, 126  ;;  %vm104_vm2 = vcmp.lt.s32.totalorder %v73_v28, 112  ;;  %vm119_vm3 = vcmp.lt.s32.totalorder %v73_v28, 111  ;;  %s410_s5 = smov [#allocation8]   ;;  %s244_s9 = sshll.u32 %s468_s3, 4  ;;  %s245_s9 = int_to_ptr.hbm [resolvable:$true] %s244_s9 }
  0x13   :  { %vm134_vm4 = vcmp.lt.s32.totalorder %v73_v28, 110  ;;  %vm149_vm5 = vcmp.lt.s32.totalorder %v73_v28, 96  ;;  %vm164_vm6 = vcmp.lt.s32.totalorder %v73_v28, 95  ;;  %vm179_vm7 = vcmp.lt.s32.totalorder %v73_v28, 94  ;;  %s242_s6 = sshll.u32 %s410_s5, 4  ;;  %s243_s6 = int_to_ptr.vmem [resolvable:$true] %s242_s6 }
  0x17   :  { %279 = vset.pattern.permute.xlu1 %v397_v5  ;;  %70 = vrot.lane.b32.xlu0 %v444_v4, %s395_s0 }
  0x18   :  { %78 = vperm.xlu1 %279, %v58_v2   ;;  %87 = vrot.lane.b32.xlu2 %v444_v4, %s396_s2 }
  0x1f   :  { %93 = vperm.xlu0 %280, %v58_v2  }
  0x20   :  { %100 = vrot.lane.b32.xlu1 %v440_v3, %s398_s26  ;;  %102 = vrot.lane.b32.xlu2 %v444_v4, %s398_s26 }
  0x21   :  { %281 = vset.pattern.permute.xlu1 %v399_v6 }
  0x27   :  { %117 = vrot.lane.b32.xlu0 %v444_v4, %s400_s27 }
  0x28   :  { %108 = vperm.xlu1 %281, %v58_v2   ;;  %115 = vrot.lane.b32.xlu2 %v440_v3, %s400_s27 }
  0x29   :  { %287 = vset.pattern.permute.xlu0 %v401_v7 }
  0x2f   :  { %132 = vrot.lane.b32.xlu0 %v444_v4, %s402_s28 }
  0x30   :  { %282 = vset.pattern.permute.xlu1 %v403_v8  ;;  %130 = vrot.lane.b32.xlu2 %v440_v3, %s402_s28 }
  0x31   :  { %123 = vperm.xlu1 %282, %v58_v2  }
  0x37   :  { %147 = vrot.lane.b32.xlu0 %v444_v4, %s404_s29 }
  0x38   :  { %145 = vrot.lane.b32.xlu2 %v440_v3, %s404_s29 }
  0x39   :  { %283 = vset.pattern.permute.xlu1 %v405_v9 }
  0x3a   :  { %138 = vperm.xlu1 %283, %v58_v2  }
  0x3f   :  { %162 = vrot.lane.b32.xlu0 %v444_v4, %s406_s30 }
  0x40   :  { %160 = vrot.lane.b32.xlu2 %v440_v3, %s406_s30 }
  0x42   :  { %284 = vset.pattern.permute.xlu1 %v407_v10 }
  0x43   :  { %153 = vperm.xlu1 %284, %v58_v2  }
  0x47   :  { %177 = vrot.lane.b32.xlu0 %v444_v4, %s408_s4 }
  0x48   :  { %175 = vrot.lane.b32.xlu2 %v440_v3, %s408_s4 }
  0x4b   :  { %285 = vset.pattern.permute.xlu1 %v409_v11 }
  0x4c   :  { %168 = vperm.xlu1 %285, %v58_v2  }
  0x54   :  { %286 = vset.pattern.permute.xlu1 %v401_v7 }
  0x55   :  { %183 = vperm.xlu1 %286, %v58_v2  }
  0x6a   :  { %v86_v12 = vpop.permute.xlu2 %85 }
  0x72   :  { %v88_v15 = vpop.permute.xlu2 %87 }
  0x73   :  { %v90_v38 = vsel %vm89_vm1, %v86_v12, %v88_v15  ;;  %v91_v41 = vsel %vm89_vm1, %v88_v15, %v86_v12 }
  0x7a   :  { %v103_v18 = vpop.permute.xlu2 %102 }
  0x81   :  { %v62_v13 = vpop.permute.xlu1 %61  ;;  %v69_v14 = vpop.permute.xlu0 %68 }
  0x82   :  { %v116_v21 = vpop.permute.xlu2 %115  ;;  %v64_v36 = vmul.f32 %v62_v13, %v440_v3  ;;  %v65_v43 = vmul.f32 %v62_v13, %v444_v4 }
  0x89   :  { %v71_v16 = vpop.permute.xlu0 %70 }
  0x8a   :  { %v79_v17 = vpop.permute.xlu1 %78  ;;  %v131_v25 = vpop.permute.xlu2 %130  ;;  %v75_v32 = vsel %vm74_vm0, %v69_v14, %v71_v16  ;;  %v76_v33 = vsel %vm74_vm0, %v71_v16, %v69_v14 }
  0x8b   :  { %v81_v35 = vmul.f32 %v79_v17, %v75_v32  ;;  %v82_v37 = vmul.f32 %v79_v17, %v76_v33 }
  0x8d   :  { %v83_v44 = vadd.f32 %v81_v35, %v64_v36  ;;  %v84_v50 = vadd.f32 %v82_v37, %v65_v43 }
  0x91   :  { %v94_v19 = vpop.permute.xlu0 %93 }
  0x92   :  { %v101_v20 = vpop.permute.xlu1 %100  ;;  %v146_v30 = vpop.permute.xlu2 %145  ;;  %v96_v42 = vmul.f32 %v94_v19, %v90_v38  ;;  %v97_v45 = vmul.f32 %v94_v19, %v91_v41 }
  0x93   :  { %v105_v46 = vsel %vm104_vm2, %v101_v20, %v103_v18  ;;  %v106_v47 = vsel %vm104_vm2, %v103_v18, %v101_v20 }
  0x94   :  { %v98_v53 = vadd.f32 %v96_v42, %v83_v44  ;;  %v99_v56 = vadd.f32 %v97_v45, %v84_v50 }
  0x99   :  { %v118_v23 = vpop.permute.xlu0 %117 }
  0x9a   :  { %v109_v22 = vpop.permute.xlu1 %108  ;;  %v161_v39 = vpop.permute.xlu2 %160  ;;  %v120_v48 = vsel %vm119_vm3, %v116_v21, %v118_v23  ;;  %v121_v49 = vsel %vm119_vm3, %v118_v23, %v116_v21 }
  0x9b   :  { %v111_v51 = vmul.f32 %v109_v22, %v105_v46  ;;  %v112_v52 = vmul.f32 %v109_v22, %v106_v47 }
  0x9d   :  { %v113_v62 = vadd.f32 %v111_v51, %v98_v53  ;;  %v114_v63 = vadd.f32 %v112_v52, %v99_v56 }
  0xa1   :  { %v133_v26 = vpop.permute.xlu0 %132 }
  0xa2   :  { %v135_v54 = vsel %vm134_vm4, %v131_v25, %v133_v26  ;;  %v136_v55 = vsel %vm134_vm4, %v133_v26, %v131_v25  ;;  %v176_v8 = vpop.permute.xlu2 %175  ;;  %v190_v25 = vld [vmem:[#allocation5] sm:$0xff] }
  0xa3   :  { %v124_v24 = vpop.permute.xlu1 %123 }
  0xa4   :  { %v126_v57 = vmul.f32 %v124_v24, %v120_v48  ;;  %v127_v58 = vmul.f32 %v124_v24, %v121_v49 }
  0xa6   :  { %v128_v4 = vadd.f32 %v126_v57, %v113_v62  ;;  %v129_v5 = vadd.f32 %v127_v58, %v114_v63 }
  0xa9   :  { %v148_v31 = vpop.permute.xlu0 %147 }
  0xaa   :  { %v150_v60 = vsel %vm149_vm5, %v146_v30, %v148_v31  ;;  %v151_v61 = vsel %vm149_vm5, %v148_v31, %v146_v30 }
  0xac   :  { %v139_v29 = vpop.permute.xlu1 %138 }
  0xad   :  { %v141_v0 = vmul.f32 %v139_v29, %v135_v54  ;;  %v142_v1 = vmul.f32 %v139_v29, %v136_v55 }
  0xaf   :  { %v143_v10 = vadd.f32 %v141_v0, %v128_v4  ;;  %v144_v11 = vadd.f32 %v142_v1, %v129_v5 }
  0xb1   :  { %v163_v40 = vpop.permute.xlu0 %162 }
  0xb2   :  { %v165_v2 = vsel %vm164_vm6, %v161_v39, %v163_v40  ;;  %v166_v3 = vsel %vm164_vm6, %v163_v40, %v161_v39 }
  0xb5   :  { %v154_v34 = vpop.permute.xlu1 %153 }
  0xb6   :  { %v156_v6 = vmul.f32 %v154_v34, %v150_v60  ;;  %v157_v7 = vmul.f32 %v154_v34, %v151_v61 }
  0xb8   :  { %v158_v16 = vadd.f32 %v156_v6, %v143_v10  ;;  %v159_v17 = vadd.f32 %v157_v7, %v144_v11 }
  0xb9   :  { %v178_v9 = vpop.permute.xlu0 %177 }
  0xba   :  { %v180_v14 = vsel %vm179_vm7, %v176_v8, %v178_v9  ;;  %v181_v15 = vsel %vm179_vm7, %v178_v9, %v176_v8 }
  0xbe   :  { %v169_v59 = vpop.permute.xlu1 %168 }
  0xbf   :  { %v171_v12 = vmul.f32 %v169_v59, %v165_v2  ;;  %v172_v13 = vmul.f32 %v169_v59, %v166_v3 }
  0xc1   :  { %v173_v21 = vadd.f32 %v171_v12, %v158_v16  ;;  %v174_v22 = vadd.f32 %v172_v13, %v159_v17 }
  0xc7   :  { %v184_v18 = vpop.permute.xlu1 %183 }
  0xc8   :  { %v186_v19 = vmul.f32 %v184_v18, %v180_v14  ;;  %v187_v20 = vmul.f32 %v184_v18, %v181_v15 }
  0xca   :  { %v188_v23 = vadd.f32 %v186_v19, %v173_v21  ;;  %v189_v24 = vadd.f32 %v187_v20, %v174_v22 }
  0xcc   :  { %210 = vmatpush.msra.mxu0 %v188_v23  ;;  %230 = vmatpush.msra.mxu1 %v189_v24 }
  0xcd   :  { %255 = vmatmul.msk.f32.vlgmr.msra.gmra.mxu0 %vm191_vm8, %v190_v25  ;;  %256 = vmatmul.msk.f32.vlgmr.msra.gmra.mxu1 %vm191_vm8, %v190_v25 }
 0x14a   :  { %v212_v26 = vpop.f32.mrf.mxu0  ;;  %v232_v27 = vpop.f32.mrf.mxu1 }
 0x14b   :  { %235 = vst [vmem:[#allocation8] sm:$0xff] %v212_v26 }
 0x14c   :  { %236 = vst [vmem:[#allocation8 + $0x8] sm:$0xff] %v232_v27 }
 0x14d   :  { %247 = dma.vmem_to_hbm [thread:$0]  %s243_s6, 256, %s245_s9, [#allocation4]  }
 0x14e   :  { %388 = dma.done.wait [#allocation4], 256  }
 0x14f   :  { %389 = vsyncadd [#allocation4], 4294967040 }
 0x150   :  { %252 = vsyncpa [#allocation3], 1 }
 0x151   :  { %253 = vsyncpa [#allocation6], 1 }
 0x152   :  { %254 = vsyncpa [#allocation4], 1 }

</bundles_post_ra>
